<compile_context>
chip_gen: v7x
topology: tpu7x:2x2x1
jax: 0.10.0
libtpu: 0.0.40
codegen_flags: <defaults>
</compile_context>

<pallas_src>
import functools

import jax
import jax.numpy as jnp
from jax.experimental import pallas as pl
from jax.experimental.pallas import tpu as pltpu

GAMMA = 1.5
ALPHA = 0.25
LANE = 128
SUBLANE = 8
MAX_BLOCK_ROWS = 2048  # 2048 x 128 f32 = 1 MiB per input block


def _focal_loss_kernel(pred_ref, true_ref, out_ref, *,
                       gamma, alpha, num_blocks, block_rows, last_rows):
    x = pred_ref[...].astype(jnp.float32)   # logits,  (block_rows, 128)
    y = true_ref[...].astype(jnp.float32)   # targets, (block_rows, 128)

    # Shared transcendental: e = exp(-|x|) drives both BCE and sigmoid.
    e = jnp.exp(-jnp.abs(x))
    # Numerically-stable BCE-with-logits, reduction='none'.
    bce = jnp.maximum(x, 0.0) - x * y + jnp.log1p(e)
    # sigmoid(x) from the same e: x>=0 -> 1/(1+e), x<0 -> e/(1+e).
    inv = 1.0 / (1.0 + e)
    p = jnp.where(x >= 0.0, inv, e * inv)

    p_t = y * p + (1.0 - y) * (1.0 - p)
    alpha_factor = y * alpha + (1.0 - y) * (1.0 - alpha)
    z = jnp.maximum(1.0 - p_t, 0.0)

    # (1 - p_t) ** gamma, specialised for the common static gammas.
    if gamma == 0.0:
        mod = jnp.ones_like(z)
    elif gamma == 1.0:
        mod = z
    elif gamma == 1.5:
        mod = z * jnp.sqrt(z)
    elif gamma == 2.0:
        mod = z * z
    else:
        mod = jnp.exp(gamma * jnp.log(z))   # exp(-inf)=0 matches pow(0, gamma>0)

    loss = bce * alpha_factor * mod

    def _partial(vals):
        # (block_rows, 128) -> (8, 128) partial sum.  The reshape is
        # layout-preserving ((8,128) vreg tiles untouched); the sum over the
        # leading axis is pure vreg-wise VPU adds (no XLU).
        return vals.reshape(block_rows // SUBLANE, SUBLANE, LANE) \
                   .sum(axis=0).reshape(1, SUBLANE, LANE)

    if last_rows != block_rows:
        # Only the (statically-known) partial last block needs row masking,
        # to drop data read past the end of the array.
        is_last = pl.program_id(0) == num_blocks - 1

        @pl.when(is_last)
        def _():
            row_idx = jax.lax.broadcasted_iota(jnp.int32, loss.shape, 0)
            out_ref[...] = _partial(jnp.where(row_idx < last_rows, loss, 0.0))

        @pl.when(jnp.logical_not(is_last))
        def _():
            out_ref[...] = _partial(loss)
    else:
        out_ref[...] = _partial(loss)


def focal_loss(pred, true, gamma=GAMMA, alpha=ALPHA, reduction="mean"):
    """Focal loss over arbitrarily-shaped logits/targets (mean or sum)."""
    assert pred.shape == true.shape
    n = int(pred.size)

    pred_flat = jnp.ravel(pred)
    true_flat = jnp.ravel(true)

    # Pad the (<= 1023 element) tail up to a multiple of 8*128.  Padded
    # elements use (logit=-100, target=0) and contribute exactly 0 in f32,
    # so no per-element mask is needed on the hot path.  When the size is
    # already aligned (the common case) this is a zero-copy reshape.
    tile = SUBLANE * LANE
    n_pad = pl.cdiv(n, tile) * tile
    pad = n_pad - n
    if pad:
        pred_flat = jnp.pad(pred_flat, (0, pad), constant_values=-100.0)
        true_flat = jnp.pad(true_flat, (0, pad), constant_values=0.0)

    rows = n_pad // LANE                      # multiple of 8
    # Balance blocks across the grid (helps megacore / pipelining) and round
    # to the sublane granule; cap at MAX_BLOCK_ROWS for VMEM.
    num_blocks = pl.cdiv(rows, MAX_BLOCK_ROWS)
    block_rows = min(rows, pl.cdiv(pl.cdiv(rows, num_blocks), SUBLANE) * SUBLANE)
    num_blocks = pl.cdiv(rows, block_rows)
    last_rows = rows - (num_blocks - 1) * block_rows   # multiple of 8, >= 8

    pred2d = pred_flat.reshape(rows, LANE)
    true2d = true_flat.reshape(rows, LANE)

    kernel = functools.partial(
        _focal_loss_kernel,
        gamma=float(gamma), alpha=float(alpha),
        num_blocks=num_blocks, block_rows=block_rows, last_rows=last_rows,
    )

    partials = pl.pallas_call(
        kernel,
        out_shape=jax.ShapeDtypeStruct((num_blocks, SUBLANE, LANE), jnp.float32),
        grid=(num_blocks,),
        in_specs=[
            pl.BlockSpec((block_rows, LANE), lambda i: (i, 0)),
            pl.BlockSpec((block_rows, LANE), lambda i: (i, 0)),
        ],
        out_specs=pl.BlockSpec((1, SUBLANE, LANE), lambda i: (i, 0, 0)),
        compiler_params=pltpu.CompilerParams(
            dimension_semantics=("parallel",)),
    )(pred2d, true2d)

    total = jnp.sum(partials)
    if reduction == "mean":
        return total / jnp.float32(n)
    elif reduction == "sum":
        return total
    # TODO(synk): reduction='none' (per-element output) would need a
    # different (elementwise-output) kernel; module default is 'mean'.
    raise ValueError(f"unsupported reduction: {reduction}")


def _focal_loss_ref(pred, true, gamma=GAMMA, alpha=ALPHA):
    """Pure-JAX reference (mirrors the PyTorch module)."""
    x = pred.astype(jnp.float32)
    y = true.astype(jnp.float32)
    bce = jnp.maximum(x, 0.0) - x * y + jnp.log1p(jnp.exp(-jnp.abs(x)))
    p = jax.nn.sigmoid(x)
    p_t = y * p + (1 - y) * (1 - p)
    alpha_factor = y * alpha + (1 - y) * (1 - alpha)
    modulating_factor = (1.0 - p_t) ** gamma
    return jnp.mean(bce * alpha_factor * modulating_factor)


if __name__ == "__main__":
    key = jax.random.PRNGKey(0)
    k1, k2 = jax.random.split(key)
    # Typical YOLO objectness/class logits: NCHW = (B, C, H, W)
    B, C, H, W = 2, 4, 16, 16
    pred = jax.random.normal(k1, (B, C, H, W), dtype=jnp.float32) * 3.0
    true = (jax.random.uniform(k2, (B, C, H, W)) > 0.7).astype(jnp.float32)

    out = focal_loss(pred, true)
    out = jax.block_until_ready(out)

    ref = _focal_loss_ref(pred, true)
    assert jnp.allclose(out, ref, rtol=1e-5, atol=1e-6), (out, ref)
    print("KERNEL_OK")
</pallas_src>

<mosaic_0001>
module attributes {stable_mosaic.version = 11 : i64} {
  func.func @_focal_loss_kernel(%arg0: i32, %arg1: memref<16x128xf32, #tpu.memory_space<vmem>>, %arg2: memref<16x128xf32, #tpu.memory_space<vmem>>, %arg3: memref<1x8x128xf32, #tpu.memory_space<vmem>>) attributes {dimension_semantics = [#tpu.dimension_semantics<parallel>], iteration_bounds = array<i64: 1>, scalar_prefetch = 0 : i64, scratch_operands = 0 : i64, tpu.core_type = #tpu.core_type<tc>, window_params = [{transform_indices = @transform_0, window_bounds = array<i64: 16, 128>}, {transform_indices = @transform_1, window_bounds = array<i64: 16, 128>}, {transform_indices = @transform_2, window_bounds = array<i64: 1, 8, 128>}]} {
    %c0 = arith.constant 0 : index
    %c0_0 = arith.constant 0 : index
    %0 = vector.load %arg1[%c0, %c0_0] : memref<16x128xf32, #tpu.memory_space<vmem>>, vector<16x128xf32>
    %c0_1 = arith.constant 0 : index
    %c0_2 = arith.constant 0 : index
    %1 = vector.load %arg2[%c0_1, %c0_2] : memref<16x128xf32, #tpu.memory_space<vmem>>, vector<16x128xf32>
    %2 = math.absf %0 : vector<16x128xf32>
    %cst = arith.constant 0.000000e+00 : f32
    %3 = vector.broadcast %cst : f32 to vector<16x128xf32>
    %4 = arith.subf %3, %2 : vector<16x128xf32>
    %5 = math.exp %4 : vector<16x128xf32>
    %cst_3 = arith.constant 0.000000e+00 : f32
    %6 = vector.broadcast %cst_3 : f32 to vector<16x128xf32>
    %7 = arith.maximumf %0, %6 : vector<16x128xf32>
    %8 = arith.mulf %0, %1 : vector<16x128xf32>
    %9 = arith.subf %7, %8 : vector<16x128xf32>
    %10 = math.log1p %5 : vector<16x128xf32>
    %11 = arith.addf %9, %10 : vector<16x128xf32>
    %cst_4 = arith.constant 1.000000e+00 : f32
    %12 = vector.broadcast %cst_4 : f32 to vector<16x128xf32>
    %13 = arith.addf %12, %5 : vector<16x128xf32>
    %cst_5 = arith.constant 1.000000e+00 : f32
    %14 = vector.broadcast %cst_5 : f32 to vector<16x128xf32>
    %15 = arith.divf %14, %13 : vector<16x128xf32>
    %cst_6 = arith.constant 0.000000e+00 : f32
    %16 = vector.broadcast %cst_6 : f32 to vector<16x128xf32>
    %17 = arith.cmpf oge, %0, %16 : vector<16x128xf32>
    %18 = arith.mulf %5, %15 : vector<16x128xf32>
    %19 = arith.select %17, %15, %18 : vector<16x128xi1>, vector<16x128xf32>
    %20 = arith.mulf %1, %19 : vector<16x128xf32>
    %cst_7 = arith.constant 1.000000e+00 : f32
    %21 = vector.broadcast %cst_7 : f32 to vector<16x128xf32>
    %22 = arith.subf %21, %1 : vector<16x128xf32>
    %cst_8 = arith.constant 1.000000e+00 : f32
    %23 = vector.broadcast %cst_8 : f32 to vector<16x128xf32>
    %24 = arith.subf %23, %19 : vector<16x128xf32>
    %25 = arith.mulf %22, %24 : vector<16x128xf32>
    %26 = arith.addf %20, %25 : vector<16x128xf32>
    %cst_9 = arith.constant 2.500000e-01 : f32
    %27 = vector.broadcast %cst_9 : f32 to vector<16x128xf32>
    %28 = arith.mulf %1, %27 : vector<16x128xf32>
    %cst_10 = arith.constant 1.000000e+00 : f32
    %29 = vector.broadcast %cst_10 : f32 to vector<16x128xf32>
    %30 = arith.subf %29, %1 : vector<16x128xf32>
    %cst_11 = arith.constant 7.500000e-01 : f32
    %31 = vector.broadcast %cst_11 : f32 to vector<16x128xf32>
    %32 = arith.mulf %30, %31 : vector<16x128xf32>
    %33 = arith.addf %28, %32 : vector<16x128xf32>
    %cst_12 = arith.constant 1.000000e+00 : f32
    %34 = vector.broadcast %cst_12 : f32 to vector<16x128xf32>
    %35 = arith.subf %34, %26 : vector<16x128xf32>
    %cst_13 = arith.constant 0.000000e+00 : f32
    %36 = vector.broadcast %cst_13 : f32 to vector<16x128xf32>
    %37 = arith.maximumf %35, %36 : vector<16x128xf32>
    %38 = math.sqrt %37 : vector<16x128xf32>
    %39 = arith.mulf %37, %38 : vector<16x128xf32>
    %40 = arith.mulf %11, %33 : vector<16x128xf32>
    %41 = arith.mulf %40, %39 : vector<16x128xf32>
    %42 = vector.shape_cast %41 : vector<16x128xf32> to vector<2x8x128xf32>
    %cst_14 = arith.constant dense<0.000000e+00> : vector<8x128xf32>
    %43 = vector.multi_reduction <add>, %42, %cst_14 [0] : vector<2x8x128xf32> to vector<8x128xf32>
    %44 = vector.shape_cast %43 : vector<8x128xf32> to vector<1x8x128xf32>
    %c0_15 = arith.constant 0 : index
    %c0_16 = arith.constant 0 : index
    %c0_17 = arith.constant 0 : index
    %45 = vector.load %arg3[%c0_15, %c0_16, %c0_17] : memref<1x8x128xf32, #tpu.memory_space<vmem>>, vector<1x8x128xf32>
    tpu.vector_store %arg3[%c0_15, %c0_16, %c0_17], %44 {strides = array<i32>} : memref<1x8x128xf32, #tpu.memory_space<vmem>>, vector<1x8x128xf32>,
    return
  }
  func.func @transform_0(%arg0: i32) -> (i32, i32) {
    %c0_i32 = arith.constant 0 : i32
    %c0_i32_0 = arith.constant 0 : i32
    return %arg0, %c0_i32 : i32, i32
  }
  func.func @transform_1(%arg0: i32) -> (i32, i32) {
    %c0_i32 = arith.constant 0 : i32
    %c0_i32_0 = arith.constant 0 : i32
    return %arg0, %c0_i32 : i32, i32
  }
  func.func @transform_2(%arg0: i32) -> (i32, i32, i32) {
    %c0_i32 = arith.constant 0 : i32
    %c0_i32_0 = arith.constant 0 : i32
    %c0_i32_1 = arith.constant 0 : i32
    return %arg0, %c0_i32, %c0_i32_0 : i32, i32, i32
  }
}

</mosaic_0001>

<bundles_post_ra>
// kernel: tpu_custom_call.1
= control target key start
LH: loop header
LB: loop body
LE: loop exit
PB: predicated region body
PF: predicated region fallthrough
CT: control target
= control target key end

     0   :  { %7 = vsyncpa [#allocation3], 0  ;;  %s309_s0 = inlined_call_operand.hbm [shape: f32[16,128], index: 0, kind: input, shape index: {}]   ;;  %s310_s1 = inlined_call_operand.hbm [shape: f32[16,128], index: 1, kind: input, shape index: {}]   ;;  %s311_s2 = inlined_call_operand.hbm [shape: f32[1,8,128], index: 2, kind: output, shape index: {}]  }
   0x1   :  { %8 = vsyncpa [#allocation6], 0 }
   0x2   :  { %9 = vsyncpa [#allocation4], 0  ;;  %s241_s9 = smov [#allocation2]   ;;  %s169_s13 = scalar_lea.hbm %s309_s0, 256 }
   0x3   :  { %s15_s10 = sshll.u32 %s241_s9, 4  ;;  %p170_p0 = scmp.ne.s32.totalorder %s309_s0, %s169_s13  ;;  %s16_s10 = int_to_ptr.vmem [resolvable:$true] %s15_s10 }
   0x4   :  { %p173_p1 = scmp.lt.u32.totalorder %s169_s13, %s309_s0 }
   0x6   :  { %p175_p2 = pnand %p173_p1, %p170_p0 }
   0x8   :  { %178 = shalt.err (!%p175_p2)
}
   0x9   :  { %s179_s18 = scalar_lea.vmem %s16_s10, 256  ;;  %p184_p4 = scmp.lt.s32.totalorder %s16_s10, %s16_s10 }
   0xa   :  { %p180_p3 = scmp.ne.s32.totalorder %s16_s10, %s179_s18  ;;  %p185_p5 = scmp.lt.s32.totalorder %s179_s18, %s179_s18 }
   0xc   :  { %p186_p6 = por %p185_p5, %p184_p4 }
   0xe   :  { %p187_p7 = pnand %p186_p6, %p180_p3 }
  0x10   :  { %190 = shalt.err (!%p187_p7)
}
  0x11   :  { %s242_s19 = smov 128   ;;  %s243_s20 = smov 8  }
  0x12   :  { %21 = dma.hbm_to_vmem [thread:$0]  %s309_s0, 256, %s16_s10, [#allocation3], %s242_s19, %s242_s19, %s243_s20  }
  0x13   :  { %s244_s23 = smov [#allocation5]   ;;  %s191_s27 = scalar_lea.hbm %s310_s1, 256 }
  0x14   :  { %s27_s24 = sshll.u32 %s244_s23, 4  ;;  %p192_p8 = scmp.ne.s32.totalorder %s310_s1, %s191_s27  ;;  %s28_s24 = int_to_ptr.vmem [resolvable:$true] %s27_s24 }
  0x15   :  { %p195_p9 = scmp.lt.u32.totalorder %s191_s27, %s310_s1 }
  0x17   :  { %p197_p10 = pnand %p195_p9, %p192_p8 }
  0x19   :  { %200 = shalt.err (!%p197_p10)
}
  0x1a   :  { %s201_s4 = scalar_lea.vmem %s28_s24, 256  ;;  %p206_p12 = scmp.lt.s32.totalorder %s28_s24, %s28_s24 }
  0x1b   :  { %p202_p11 = scmp.ne.s32.totalorder %s28_s24, %s201_s4  ;;  %p207_p13 = scmp.lt.s32.totalorder %s201_s4, %s201_s4 }
  0x1d   :  { %p208_p0 = por %p207_p13, %p206_p12 }
  0x1f   :  { %p209_p1 = pnand %p208_p0, %p202_p11 }
  0x21   :  { %212 = shalt.err (!%p209_p1)
}
  0x22   :  { %33 = dma.hbm_to_vmem [thread:$0]  %s310_s1, 256, %s28_s24, [#allocation6], %s242_s19, %s242_s19, %s243_s20  }
  0x23   :  { %235 = dma.done.wait [#allocation3], 256  }
  0x24   :  { %236 = vsyncadd [#allocation3], 4294967040 }
  0x25   :  { %237 = dma.done.wait [#allocation6], 256  }
  0x26   :  { %238 = vsyncadd [#allocation6], 4294967040  ;;  %v285_v0 = vld [vmem:[#allocation2] sm:$0xff]  ;;  %v287_v1 = vld [vmem:[#allocation2 + $0x8] sm:$0xff]  ;;  %s245_s1 = smov [#allocation7]  }
  0x27   :  { %v44_v2 = vand.u32 2147483647, %v285_v0  ;;  %v45_v3 = vand.u32 2147483647, %v287_v1  ;;  %v42_v12 = vld [vmem:[#allocation5] sm:$0xff]  ;;  %v43_v14 = vld [vmem:[#allocation5 + $0x8] sm:$0xff] }
  0x28   :  { %vm84_vm0 = vcmp.ge.f32.partialorder %v285_v0, 0.0  ;;  %vm85_vm1 = vcmp.ge.f32.partialorder %v287_v1, 0.0  ;;  %v92_v18 = vsub.f32 1.0, %v42_v12  ;;  %v93_v20 = vsub.f32 1.0, %v43_v14  ;;  %s138_s6 = sshll.u32 %s245_s1, 4  ;;  %s139_s6 = int_to_ptr.vmem [resolvable:$true] %s138_s6 }
  0x29   :  { %v46_v4 = vsub.f32 0.0, %v44_v2  ;;  %v47_v5 = vsub.f32 0.0, %v45_v3  ;;  %v52_v42 = vmax.f32 %v285_v0, 0.0  ;;  %v54_v43 = vmul.f32 %v42_v12, %v285_v0  ;;  %s213_s7 = scalar_lea.vmem %s139_s6, 128  ;;  %p218_p3 = scmp.lt.s32.totalorder %s139_s6, %s139_s6 }
  0x2a   :  { %v53_v44 = vmax.f32 %v287_v1, 0.0  ;;  %v55_v45 = vmul.f32 %v43_v14, %v287_v1  ;;  %v100_v51 = vmul.f32 0.25, %v42_v12  ;;  %v102_v52 = vmul.f32 0.75, %v92_v18  ;;  %p214_p2 = scmp.ne.s32.totalorder %s139_s6, %s213_s7  ;;  %p219_p4 = scmp.lt.s32.totalorder %s213_s7, %s213_s7 }
  0x2b   :  { %v48_v6 = vmul.f32 1.442695, %v46_v4  ;;  %v50_v7 = vmul.f32 1.442695, %v47_v5  ;;  %v56_v50 = vsub.f32 %v52_v42, %v54_v43  ;;  %v101_v55 = vmul.f32 0.25, %v43_v14 }
  0x2c   :  { %v57_v53 = vsub.f32 %v53_v44, %v55_v45  ;;  %v103_v56 = vmul.f32 0.75, %v93_v20  ;;  %v104_v59 = vadd.f32 %v102_v52, %v100_v51  ;;  %p220_p5 = por %p219_p4, %p218_p3 }
  0x2d   :  { %153 = vpow2.f32 %v48_v6 }
  0x2e   :  { %155 = vpow2.f32 %v50_v7  ;;  %v105_v62 = vadd.f32 %v103_v56, %v101_v55  ;;  %p221_p6 = pnand %p220_p5, %p214_p2 }
  0x37   :  { %v154_v8 = vpop.eup %153 }
  0x38   :  { %v156_v9 = vpop.eup %155  ;;  %v58_v10 = vadd.f32 1.0, %v154_v8  ;;  %v61_v28 = vmul.f32 -0.5, %v154_v8  ;;  %v64_v37 = vand.u32 2147483647, %v154_v8 }
  0x39   :  { %v67_v11 = vadd.f32 1.0, %v156_v9  ;;  %v70_v30 = vmul.f32 -0.5, %v156_v9  ;;  %v73_v41 = vand.u32 2147483647, %v156_v9 }
  0x3a   :  { %157 = vrcp.f32 %v58_v10  ;;  %v62_v34 = vadd.f32 1.0, %v61_v28  ;;  %vm65_vm2 = vcmp.lt.f32.partialorder %v64_v37, 0.0004427343 }
  0x3b   :  { %159 = vrcp.f32 %v67_v11  ;;  %v71_v38 = vadd.f32 1.0, %v70_v30  ;;  %vm74_vm3 = vcmp.lt.f32.partialorder %v73_v41, 0.0004427343 }
  0x3c   :  { %161 = vlog2.f32 %v58_v10  ;;  %v63_v47 = vmul.f32 %v154_v8, %v62_v34 }
  0x3d   :  { %163 = vlog2.f32 %v67_v11  ;;  %v72_v49 = vmul.f32 %v156_v9, %v71_v38 }
  0x44   :  { %v158_v13 = vpop.eup %157 }
  0x45   :  { %v160_v15 = vpop.eup %159  ;;  %v86_v16 = vmul.f32 %v158_v13, %v154_v8 }
  0x46   :  { %v87_v17 = vmul.f32 %v160_v15, %v156_v9  ;;  %v162_v36 = vpop.eup %161 }
  0x47   :  { %v88_v19 = vsel %vm84_vm0, %v158_v13, %v86_v16  ;;  %v164_v40 = vpop.eup %163  ;;  %v60_v46 = vmul.f32 0.6931472, %v162_v36 }
  0x48   :  { %v89_v21 = vsel %vm85_vm1, %v160_v15, %v87_v17  ;;  %v90_v22 = vmul.f32 %v88_v19, %v42_v12  ;;  %v94_v23 = vsub.f32 1.0, %v88_v19  ;;  %v69_v48 = vmul.f32 0.6931472, %v164_v40 }
  0x49   :  { %v91_v24 = vmul.f32 %v89_v21, %v43_v14  ;;  %v95_v25 = vsub.f32 1.0, %v89_v21  ;;  %v66_v54 = vsel %vm65_vm2, %v63_v47, %v60_v46 }
  0x4a   :  { %v96_v26 = vmul.f32 %v94_v23, %v92_v18  ;;  %v75_v57 = vsel %vm74_vm3, %v72_v49, %v69_v48  ;;  %v76_v58 = vadd.f32 %v66_v54, %v56_v50 }
  0x4b   :  { %v97_v27 = vmul.f32 %v95_v25, %v93_v20  ;;  %v77_v61 = vadd.f32 %v75_v57, %v57_v53 }
  0x4c   :  { %v98_v29 = vadd.f32 %v96_v26, %v90_v22  ;;  %v126_v5 = vmul.f32 %v104_v59, %v76_v58 }
  0x4d   :  { %v99_v31 = vadd.f32 %v97_v27, %v91_v24  ;;  %v127_v8 = vmul.f32 %v105_v62, %v77_v61 }
  0x4e   :  { %v106_v32 = vsub.f32 1.0, %v98_v29 }
  0x4f   :  { %v107_v33 = vsub.f32 1.0, %v99_v31 }
  0x50   :  { %v108_v35 = vmax.f32 %v106_v32, 0.0 }
  0x51   :  { %v109_v39 = vmax.f32 %v107_v33, 0.0 }
  0x52   :  { %165 = vrsqrt.f32 %v108_v35  ;;  %vm112_vm4 = vcmp.eq.f32.partialorder %v108_v35, inf  ;;  %v115_v63 = vand.u32 2147483648, %v108_v35  ;;  %vm114_vm5 = vcmp.eq.f32.partialorder %v108_v35, 0.0 }
  0x53   :  { %167 = vrsqrt.f32 %v109_v39  ;;  %vm119_vm6 = vcmp.eq.f32.partialorder %v109_v39, inf  ;;  %v122_v2 = vand.u32 2147483648, %v109_v39  ;;  %vm121_vm7 = vcmp.eq.f32.partialorder %v109_v39, 0.0 }
  0x5c   :  { %v166_v60 = vpop.eup %165 }
  0x5d   :  { %v168_v0 = vpop.eup %167  ;;  %v111_v1 = vmul.f32 %v166_v60, %v108_v35 }
  0x5e   :  { %v118_v3 = vmul.f32 %v168_v0, %v109_v39 }
  0x5f   :  { %v113_v4 = vsel %vm112_vm4, %v108_v35, %v111_v1 }
  0x60   :  { %v116_v6 = vsel %vm114_vm5, %v115_v63, %v113_v4  ;;  %v120_v7 = vsel %vm119_vm6, %v109_v39, %v118_v3 }
  0x61   :  { %v123_v9 = vsel %vm121_vm7, %v122_v2, %v120_v7  ;;  %v124_v10 = vmul.f32 %v116_v6, %v108_v35 }
  0x62   :  { %v125_v11 = vmul.f32 %v123_v9, %v109_v39 }
  0x63   :  { %v128_v12 = vmul.f32 %v126_v5, %v124_v10 }
  0x64   :  { %v129_v13 = vmul.f32 %v127_v8, %v125_v11 }
  0x66   :  { %v130_v14 = vadd.f32 %v129_v13, %v128_v12 }
  0x68   :  { %131 = vst [vmem:[#allocation7] sm:$0xff] %v130_v14 }
  0x69   :  { %224 = shalt.err (!%p221_p6)
}
  0x6a   :  { %s225_s10 = scalar_lea.hbm %s311_s2, 128 }
  0x6b   :  { %p226_p7 = scmp.ne.s32.totalorder %s311_s2, %s225_s10  ;;  %p229_p8 = scmp.lt.u32.totalorder %s225_s10, %s311_s2 }
  0x6d   :  { %p231_p9 = pnand %p229_p8, %p226_p7 }
  0x6f   :  { %234 = shalt.err (!%p231_p9)
}
  0x70   :  { %141 = dma.vmem_to_hbm [thread:$0]  %s139_s6, 128, %s311_s2, [#allocation4]  }
  0x71   :  { %239 = dma.done.wait [#allocation4], 128  }
  0x72   :  { %240 = vsyncadd [#allocation4], 4294967168 }
  0x73   :  { %145 = vsyncpa [#allocation3], 1 }
  0x74   :  { %146 = vsyncpa [#allocation6], 1 }
  0x75   :  { %147 = vsyncpa [#allocation4], 1 }

</bundles_post_ra>
